<compile_context>
chip_gen: v7x
topology: tpu7x:2x2x1
jax: 0.10.0
libtpu: 0.0.40
codegen_flags: <defaults>
</compile_context>

<pallas_src>
import jax
import jax.numpy as jnp
from jax import lax
from jax.experimental import pallas as pl
from jax.experimental.pallas import tpu as pltpu

X_SIZE = 64                       # TODO(synk): stand-in for src.models.x_size (config-dependent)
HIDDEN_DIMS = [512, 128, 32, 8]   # step_1 layer widths
EPS = 1e-5                        # nn.LayerNorm default eps

# Packed-parameter layout (rows: 0=linear bias, 1=LN gamma, 2=LN beta).
# Lane offsets are all multiples of 128 so static slices stay tile-aligned.
P_OFFS = [0, 512, 640, 768]       # per-layer (bias, gamma, beta) lane offsets
HEAD_OFF = 896                    # row 0 lanes [896:904] = w5 (8,), row 1 lane 896 = b5
PP_WIDTH = 1024                   # 8 * 128 lanes total
OUT_LANES = 16                    # fused output: lanes 0:8 = hidden, lane 8 = output


def _affine_ln_lrelu(z_nobias, pp_ref, off, dout):
    """bias add -> one-pass LayerNorm -> LeakyReLU(0.2), all in f32.

    pp_ref rows: [0]=linear bias, [1]=LN gamma, [2]=LN beta (static lane slices).
    NOTE: one-pass variance (E[z^2]-E[z]^2) is fine for the synthetic N(0,0.02)
    init; switch to a two-pass form if running with trained weights."""
    bias = pp_ref[0:1, off:off + dout]
    gamma = pp_ref[1:2, off:off + dout]
    beta = pp_ref[2:3, off:off + dout]
    z = z_nobias + bias
    inv_d = jnp.float32(1.0 / dout)
    s1 = jnp.sum(z, axis=-1, keepdims=True)
    s2 = jnp.sum(z * z, axis=-1, keepdims=True)
    mu = s1 * inv_d
    var = s2 * inv_d - mu * mu
    y = (z - mu) * lax.rsqrt(var + EPS) * gamma + beta
    return jnp.where(y > 0, y, 0.2 * y)


def wgangp_d_kernel(x_ref, w1, w2, w3, w4, pp, fused_ref):
    # Block 1: Linear(x_size, 512) -> LN -> LeakyReLU   (bf16 MXU operands, f32 acc)
    xb = x_ref[...].astype(jnp.bfloat16)
    z = jnp.dot(xb, w1[...], preferred_element_type=jnp.float32)
    h = _affine_ln_lrelu(z, pp, P_OFFS[0], HIDDEN_DIMS[0])

    # Block 2: Linear(512, 128) -> LN -> LeakyReLU
    z = jnp.dot(h.astype(jnp.bfloat16), w2[...], preferred_element_type=jnp.float32)
    h = _affine_ln_lrelu(z, pp, P_OFFS[1], HIDDEN_DIMS[1])

    # Block 3: Linear(128, 32) -> LN -> LeakyReLU
    z = jnp.dot(h.astype(jnp.bfloat16), w3[...], preferred_element_type=jnp.float32)
    h = _affine_ln_lrelu(z, pp, P_OFFS[2], HIDDEN_DIMS[2])

    # Block 4: Linear(32, 8) -> LN -> LeakyReLU
    z = jnp.dot(h.astype(jnp.bfloat16), w4[...], preferred_element_type=jnp.float32)
    h = _affine_ln_lrelu(z, pp, P_OFFS[3], HIDDEN_DIMS[3])

    # step_2: Linear(8, 1) as VPU broadcast-multiply + lane reduce (no 1-column MXU op)
    w5 = pp[0:1, HEAD_OFF:HEAD_OFF + HIDDEN_DIMS[-1]]
    b5 = pp[1:2, HEAD_OFF:HEAD_OFF + 1]
    out = jnp.sum(h * w5, axis=-1, keepdims=True) + b5

    # Fused, lane-padded output: one output array / DMA stream instead of two.
    fused_ref[...] = jnp.zeros(fused_ref.shape, fused_ref.dtype)
    fused_ref[:, 0:HIDDEN_DIMS[-1]] = h.astype(fused_ref.dtype)
    fused_ref[:, HIDDEN_DIMS[-1]:HIDDEN_DIMS[-1] + 1] = out.astype(fused_ref.dtype)


def init_params(key):
    """Deterministic synthetic init (stand-in for src.utils.init_weights).

    Returns (w1, w2, w3, w4, pp) with all matmul weights stored as bf16 and all
    per-layer vector params packed into one (3, PP_WIDTH) f32 array."""
    dims = [X_SIZE] + HIDDEN_DIMS
    weights = []
    pp = jnp.zeros((3, PP_WIDTH), jnp.float32)
    for i in range(4):
        key, kw, kb = jax.random.split(key, 3)
        din, dout = dims[i], dims[i + 1]
        w = (0.02 * jax.random.normal(kw, (din, dout), jnp.float32)).astype(jnp.bfloat16)
        weights.append(w)
        bias = 0.02 * jax.random.normal(kb, (dout,), jnp.float32)
        off = P_OFFS[i]
        pp = pp.at[0, off:off + dout].set(bias)            # linear bias
        pp = pp.at[1, off:off + dout].set(1.0)             # LN gamma
        # LN beta stays 0
    key, kw5, kb5 = jax.random.split(key, 3)
    w5 = 0.02 * jax.random.normal(kw5, (HIDDEN_DIMS[-1],), jnp.float32)
    b5 = 0.02 * jax.random.normal(kb5, (), jnp.float32)
    pp = pp.at[0, HEAD_OFF:HEAD_OFF + HIDDEN_DIMS[-1]].set(w5)
    pp = pp.at[1, HEAD_OFF].set(b5)
    return weights[0], weights[1], weights[2], weights[3], pp


def _num_tensorcores():
    """2 for megacore-style chips (v7x, v4) where the parallel grid axis shards
    across TensorCores; 1 for v5e/v6e."""
    try:
        kind = jax.devices()[0].device_kind.lower()
    except Exception:
        return 1
    return 2 if ("v7" in kind or "v4" in kind) else 1


def _pick_tb(B, num_tc):
    """Generation-aware batch-tile pick.

    single-TC (v5e/v6e): largest power-of-two tile dividing B (fewest, fattest
    steps; per-step compute is so small that extra steps are pure overhead).
    multi-TC (v7x): largest tile giving an EVEN number (>= 2) of grid steps so
    both TensorCores get balanced work."""
    cands = (2048, 1024, 512, 256, 128, 64, 32, 16, 8)
    if num_tc <= 1:
        for c in cands:
            if B % c == 0:
                return c
        return B
    for c in cands:                       # even step count, >= 2 steps
        if B % c == 0 and (B // c) >= 2 and (B // c) % 2 == 0:
            return c
    for c in cands:                       # fall back: any tiling with >= 2 steps
        if B % c == 0 and (B // c) >= 2:
            return c
    return B                              # tiny / odd batch: single tile


def wgangp_d_forward(x, params, *, tb=None):
    w1, w2, w3, w4, pp = params
    B = x.shape[0]
    if tb is None:
        tb = _pick_tb(B, _num_tensorcores())
    assert B % tb == 0, "batch must be divisible by the batch tile"
    grid = (B // tb,)

    x_spec = pl.BlockSpec((tb, X_SIZE), lambda i: (i, 0))
    # Weights + packed params are small and grid-invariant; keep fully VMEM-resident.
    w_specs = [pl.BlockSpec(w.shape, lambda i: (0, 0)) for w in (w1, w2, w3, w4)]
    pp_spec = pl.BlockSpec(pp.shape, lambda i: (0, 0))
    fused_spec = pl.BlockSpec((tb, OUT_LANES), lambda i: (i, 0))

    # Only the very largest single-TC tiles (tb >= 2048, ~16 MB of temporaries) need
    # a scoped-VMEM bump (v5e default is 16 MiB); those chips have 128 MiB physical.
    vmem_limit = (64 << 20) if tb >= 2048 else None

    fused = pl.pallas_call(
        wgangp_d_kernel,
        out_shape=jax.ShapeDtypeStruct((B, OUT_LANES), jnp.float32),
        grid_spec=pltpu.PrefetchScalarGridSpec(
            num_scalar_prefetch=0,
            grid=grid,
            in_specs=[x_spec] + w_specs + [pp_spec],
            out_specs=fused_spec,
        ),
        compiler_params=pltpu.CompilerParams(
            dimension_semantics=("parallel",),
            vmem_limit_bytes=vmem_limit),
    )(x, w1, w2, w3, w4, pp)

    hidden = fused[:, :HIDDEN_DIMS[-1]]                       # self.hidden_output
    output = fused[:, HIDDEN_DIMS[-1]:HIDDEN_DIMS[-1] + 1]    # step_2 output
    return hidden, output


def reference_forward(x, params):
    """Plain-JAX reference mirroring the module (two-pass LayerNorm), using the
    same bf16 weights so it reflects the deployed numerics."""
    w1, w2, w3, w4, pp = params
    h = x
    for w, off, dout in zip((w1, w2, w3, w4), P_OFFS, HIDDEN_DIMS):
        b = pp[0, off:off + dout]
        g = pp[1, off:off + dout]
        be = pp[2, off:off + dout]
        z = jnp.dot(h.astype(jnp.bfloat16), w, preferred_element_type=jnp.float32) + b
        mu = jnp.mean(z, axis=-1, keepdims=True)
        var = jnp.mean((z - mu) ** 2, axis=-1, keepdims=True)
        y = (z - mu) / jnp.sqrt(var + EPS) * g + be
        h = jnp.where(y > 0, y, 0.2 * y)
    w5 = pp[0, HEAD_OFF:HEAD_OFF + HIDDEN_DIMS[-1]]
    b5 = pp[1, HEAD_OFF]
    out = jnp.sum(h * w5, axis=-1, keepdims=True) + b5
    return h, out


if __name__ == "__main__":
    key = jax.random.PRNGKey(0)
    key, kx, kx2, kp = jax.random.split(key, 4)
    params = init_params(kp)

    # Small primary check (auto tile pick).
    x = jax.random.normal(kx, (16, X_SIZE), jnp.float32)
    hidden, output = wgangp_d_forward(x, params)
    jax.block_until_ready((hidden, output))
    ref_hidden, ref_output = reference_forward(x, params)
    assert jnp.allclose(hidden, ref_hidden, atol=2e-3, rtol=2e-3)
    assert jnp.allclose(output, ref_output, atol=2e-3, rtol=2e-3)

    # Multi-step grid check (exercises the index maps / pipelining path).
    x2 = jax.random.normal(kx2, (64, X_SIZE), jnp.float32)
    hidden2, output2 = wgangp_d_forward(x2, params, tb=16)
    jax.block_until_ready((hidden2, output2))
    ref_hidden2, ref_output2 = reference_forward(x2, params)
    assert jnp.allclose(hidden2, ref_hidden2, atol=2e-3, rtol=2e-3)
    assert jnp.allclose(output2, ref_output2, atol=2e-3, rtol=2e-3)

    print("KERNEL_OK")
</pallas_src>

<mosaic_0001>
module attributes {stable_mosaic.version = 11 : i64} {
  func.func @wgangp_d_kernel(%arg0: i32, %arg1: memref<16x64xf32, #tpu.memory_space<vmem>>, %arg2: memref<64x512xbf16, #tpu.memory_space<vmem>>, %arg3: memref<512x128xbf16, #tpu.memory_space<vmem>>, %arg4: memref<128x32xbf16, #tpu.memory_space<vmem>>, %arg5: memref<32x8xbf16, #tpu.memory_space<vmem>>, %arg6: memref<3x1024xf32, #tpu.memory_space<vmem>>, %arg7: memref<16x16xf32, #tpu.memory_space<vmem>>) attributes {dimension_semantics = [#tpu.dimension_semantics<parallel>], iteration_bounds = array<i64: 1>, scalar_prefetch = 0 : i64, scratch_operands = 0 : i64, tpu.core_type = #tpu.core_type<tc>, window_params = [{transform_indices = @transform_0, window_bounds = array<i64: 16, 64>}, {pipeline_mode = #tpu.pipeline_mode<synchronous>, transform_indices = @transform_1, window_bounds = array<i64: 64, 512>}, {pipeline_mode = #tpu.pipeline_mode<synchronous>, transform_indices = @transform_2, window_bounds = array<i64: 512, 128>}, {pipeline_mode = #tpu.pipeline_mode<synchronous>, transform_indices = @transform_3, window_bounds = array<i64: 128, 32>}, {pipeline_mode = #tpu.pipeline_mode<synchronous>, transform_indices = @transform_4, window_bounds = array<i64: 32, 8>}, {pipeline_mode = #tpu.pipeline_mode<synchronous>, transform_indices = @transform_5, window_bounds = array<i64: 3, 1024>}, {transform_indices = @transform_6, window_bounds = array<i64: 16, 16>}]} {
    %c0 = arith.constant 0 : index
    %c0_0 = arith.constant 0 : index
    %0 = vector.load %arg1[%c0, %c0_0] : memref<16x64xf32, #tpu.memory_space<vmem>>, vector<16x64xf32>
    %1 = arith.truncf %0 : vector<16x64xf32> to vector<16x64xbf16>
    %c0_1 = arith.constant 0 : index
    %c0_2 = arith.constant 0 : index
    %2 = vector.load %arg2[%c0_1, %c0_2] : memref<64x512xbf16, #tpu.memory_space<vmem>>, vector<64x512xbf16>
    %cst = arith.constant dense<0.000000e+00> : vector<16x512xf32>
    %3 = tpu.matmul %1, %2, %cst {dimension_numbers = #tpu.dot_dimension_numbers<[1], [0], [0], [1], [0, 0, 1, 1], [], []>} : vector<16x64xbf16>, vector<64x512xbf16>, vector<16x512xf32> -> vector<16x512xf32>
    %c0_3 = arith.constant 0 : index
    %c0_4 = arith.constant 0 : index
    %4 = vector.load %arg6[%c0_3, %c0_4] : memref<3x1024xf32, #tpu.memory_space<vmem>>, vector<1x512xf32>
    %c1 = arith.constant 1 : index
    %c0_5 = arith.constant 0 : index
    %5 = vector.load %arg6[%c1, %c0_5] : memref<3x1024xf32, #tpu.memory_space<vmem>>, vector<1x512xf32>
    %c2 = arith.constant 2 : index
    %c0_6 = arith.constant 0 : index
    %6 = vector.load %arg6[%c2, %c0_6] : memref<3x1024xf32, #tpu.memory_space<vmem>>, vector<1x512xf32>
    %7 = vector.broadcast %4 : vector<1x512xf32> to vector<16x512xf32>
    %8 = arith.addf %3, %7 : vector<16x512xf32>
    %cst_7 = arith.constant dense<0.000000e+00> : vector<16xf32>
    %9 = vector.multi_reduction <add>, %8, %cst_7 [1] : vector<16x512xf32> to vector<16xf32>
    %10 = vector.shape_cast %9 : vector<16xf32> to vector<16x1xf32>
    %11 = arith.mulf %8, %8 : vector<16x512xf32>
    %cst_8 = arith.constant dense<0.000000e+00> : vector<16xf32>
    %12 = vector.multi_reduction <add>, %11, %cst_8 [1] : vector<16x512xf32> to vector<16xf32>
    %13 = vector.shape_cast %12 : vector<16xf32> to vector<16x1xf32>
    %cst_9 = arith.constant 0.001953125 : f32
    %14 = vector.broadcast %cst_9 : f32 to vector<16x1xf32>
    %15 = arith.mulf %10, %14 : vector<16x1xf32>
    %cst_10 = arith.constant 0.001953125 : f32
    %16 = vector.broadcast %cst_10 : f32 to vector<16x1xf32>
    %17 = arith.mulf %13, %16 : vector<16x1xf32>
    %18 = arith.mulf %15, %15 : vector<16x1xf32>
    %19 = arith.subf %17, %18 : vector<16x1xf32>
    %20 = vector.broadcast %15 : vector<16x1xf32> to vector<16x512xf32>
    %21 = arith.subf %8, %20 : vector<16x512xf32>
    %cst_11 = arith.constant 9.99999974E-6 : f32
    %22 = vector.broadcast %cst_11 : f32 to vector<16x1xf32>
    %23 = arith.addf %19, %22 : vector<16x1xf32>
    %24 = math.rsqrt %23 : vector<16x1xf32>
    %25 = vector.broadcast %24 : vector<16x1xf32> to vector<16x512xf32>
    %26 = arith.mulf %21, %25 : vector<16x512xf32>
    %27 = vector.broadcast %5 : vector<1x512xf32> to vector<16x512xf32>
    %28 = arith.mulf %26, %27 : vector<16x512xf32>
    %29 = vector.broadcast %6 : vector<1x512xf32> to vector<16x512xf32>
    %30 = arith.addf %28, %29 : vector<16x512xf32>
    %cst_12 = arith.constant 0.000000e+00 : f32
    %31 = vector.broadcast %cst_12 : f32 to vector<16x512xf32>
    %32 = arith.cmpf ogt, %30, %31 : vector<16x512xf32>
    %cst_13 = arith.constant 2.000000e-01 : f32
    %33 = vector.broadcast %cst_13 : f32 to vector<16x512xf32>
    %34 = arith.mulf %33, %30 : vector<16x512xf32>
    %35 = arith.select %32, %30, %34 : vector<16x512xi1>, vector<16x512xf32>
    %36 = arith.truncf %35 : vector<16x512xf32> to vector<16x512xbf16>
    %c0_14 = arith.constant 0 : index
    %c0_15 = arith.constant 0 : index
    %37 = vector.load %arg3[%c0_14, %c0_15] : memref<512x128xbf16, #tpu.memory_space<vmem>>, vector<512x128xbf16>
    %cst_16 = arith.constant dense<0.000000e+00> : vector<16x128xf32>
    %38 = tpu.matmul %36, %37, %cst_16 {dimension_numbers = #tpu.dot_dimension_numbers<[1], [0], [0], [1], [0, 0, 1, 1], [], []>} : vector<16x512xbf16>, vector<512x128xbf16>, vector<16x128xf32> -> vector<16x128xf32>
    %c0_17 = arith.constant 0 : index
    %c512 = arith.constant 512 : index
    %39 = vector.load %arg6[%c0_17, %c512] : memref<3x1024xf32, #tpu.memory_space<vmem>>, vector<1x128xf32>
    %c1_18 = arith.constant 1 : index
    %c512_19 = arith.constant 512 : index
    %40 = vector.load %arg6[%c1_18, %c512_19] : memref<3x1024xf32, #tpu.memory_space<vmem>>, vector<1x128xf32>
    %c2_20 = arith.constant 2 : index
    %c512_21 = arith.constant 512 : index
    %41 = vector.load %arg6[%c2_20, %c512_21] : memref<3x1024xf32, #tpu.memory_space<vmem>>, vector<1x128xf32>
    %42 = vector.broadcast %39 : vector<1x128xf32> to vector<16x128xf32>
    %43 = arith.addf %38, %42 : vector<16x128xf32>
    %cst_22 = arith.constant dense<0.000000e+00> : vector<16xf32>
    %44 = vector.multi_reduction <add>, %43, %cst_22 [1] : vector<16x128xf32> to vector<16xf32>
    %45 = vector.shape_cast %44 : vector<16xf32> to vector<16x1xf32>
    %46 = arith.mulf %43, %43 : vector<16x128xf32>
    %cst_23 = arith.constant dense<0.000000e+00> : vector<16xf32>
    %47 = vector.multi_reduction <add>, %46, %cst_23 [1] : vector<16x128xf32> to vector<16xf32>
    %48 = vector.shape_cast %47 : vector<16xf32> to vector<16x1xf32>
    %cst_24 = arith.constant 7.812500e-03 : f32
    %49 = vector.broadcast %cst_24 : f32 to vector<16x1xf32>
    %50 = arith.mulf %45, %49 : vector<16x1xf32>
    %cst_25 = arith.constant 7.812500e-03 : f32
    %51 = vector.broadcast %cst_25 : f32 to vector<16x1xf32>
    %52 = arith.mulf %48, %51 : vector<16x1xf32>
    %53 = arith.mulf %50, %50 : vector<16x1xf32>
    %54 = arith.subf %52, %53 : vector<16x1xf32>
    %55 = vector.broadcast %50 : vector<16x1xf32> to vector<16x128xf32>
    %56 = arith.subf %43, %55 : vector<16x128xf32>
    %cst_26 = arith.constant 9.99999974E-6 : f32
    %57 = vector.broadcast %cst_26 : f32 to vector<16x1xf32>
    %58 = arith.addf %54, %57 : vector<16x1xf32>
    %59 = math.rsqrt %58 : vector<16x1xf32>
    %60 = vector.broadcast %59 : vector<16x1xf32> to vector<16x128xf32>
    %61 = arith.mulf %56, %60 : vector<16x128xf32>
    %62 = vector.broadcast %40 : vector<1x128xf32> to vector<16x128xf32>
    %63 = arith.mulf %61, %62 : vector<16x128xf32>
    %64 = vector.broadcast %41 : vector<1x128xf32> to vector<16x128xf32>
    %65 = arith.addf %63, %64 : vector<16x128xf32>
    %cst_27 = arith.constant 0.000000e+00 : f32
    %66 = vector.broadcast %cst_27 : f32 to vector<16x128xf32>
    %67 = arith.cmpf ogt, %65, %66 : vector<16x128xf32>
    %cst_28 = arith.constant 2.000000e-01 : f32
    %68 = vector.broadcast %cst_28 : f32 to vector<16x128xf32>
    %69 = arith.mulf %68, %65 : vector<16x128xf32>
    %70 = arith.select %67, %65, %69 : vector<16x128xi1>, vector<16x128xf32>
    %71 = arith.truncf %70 : vector<16x128xf32> to vector<16x128xbf16>
    %c0_29 = arith.constant 0 : index
    %c0_30 = arith.constant 0 : index
    %72 = vector.load %arg4[%c0_29, %c0_30] : memref<128x32xbf16, #tpu.memory_space<vmem>>, vector<128x32xbf16>
    %cst_31 = arith.constant dense<0.000000e+00> : vector<16x32xf32>
    %73 = tpu.matmul %71, %72, %cst_31 {dimension_numbers = #tpu.dot_dimension_numbers<[1], [0], [0], [1], [0, 0, 1, 1], [], []>} : vector<16x128xbf16>, vector<128x32xbf16>, vector<16x32xf32> -> vector<16x32xf32>
    %c0_32 = arith.constant 0 : index
    %c640 = arith.constant 640 : index
    %74 = vector.load %arg6[%c0_32, %c640] : memref<3x1024xf32, #tpu.memory_space<vmem>>, vector<1x32xf32>
    %c1_33 = arith.constant 1 : index
    %c640_34 = arith.constant 640 : index
    %75 = vector.load %arg6[%c1_33, %c640_34] : memref<3x1024xf32, #tpu.memory_space<vmem>>, vector<1x32xf32>
    %c2_35 = arith.constant 2 : index
    %c640_36 = arith.constant 640 : index
    %76 = vector.load %arg6[%c2_35, %c640_36] : memref<3x1024xf32, #tpu.memory_space<vmem>>, vector<1x32xf32>
    %77 = vector.broadcast %74 : vector<1x32xf32> to vector<16x32xf32>
    %78 = arith.addf %73, %77 : vector<16x32xf32>
    %cst_37 = arith.constant dense<0.000000e+00> : vector<16xf32>
    %79 = vector.multi_reduction <add>, %78, %cst_37 [1] : vector<16x32xf32> to vector<16xf32>
    %80 = vector.shape_cast %79 : vector<16xf32> to vector<16x1xf32>
    %81 = arith.mulf %78, %78 : vector<16x32xf32>
    %cst_38 = arith.constant dense<0.000000e+00> : vector<16xf32>
    %82 = vector.multi_reduction <add>, %81, %cst_38 [1] : vector<16x32xf32> to vector<16xf32>
    %83 = vector.shape_cast %82 : vector<16xf32> to vector<16x1xf32>
    %cst_39 = arith.constant 3.125000e-02 : f32
    %84 = vector.broadcast %cst_39 : f32 to vector<16x1xf32>
    %85 = arith.mulf %80, %84 : vector<16x1xf32>
    %cst_40 = arith.constant 3.125000e-02 : f32
    %86 = vector.broadcast %cst_40 : f32 to vector<16x1xf32>
    %87 = arith.mulf %83, %86 : vector<16x1xf32>
    %88 = arith.mulf %85, %85 : vector<16x1xf32>
    %89 = arith.subf %87, %88 : vector<16x1xf32>
    %90 = vector.broadcast %85 : vector<16x1xf32> to vector<16x32xf32>
    %91 = arith.subf %78, %90 : vector<16x32xf32>
    %cst_41 = arith.constant 9.99999974E-6 : f32
    %92 = vector.broadcast %cst_41 : f32 to vector<16x1xf32>
    %93 = arith.addf %89, %92 : vector<16x1xf32>
    %94 = math.rsqrt %93 : vector<16x1xf32>
    %95 = vector.broadcast %94 : vector<16x1xf32> to vector<16x32xf32>
    %96 = arith.mulf %91, %95 : vector<16x32xf32>
    %97 = vector.broadcast %75 : vector<1x32xf32> to vector<16x32xf32>
    %98 = arith.mulf %96, %97 : vector<16x32xf32>
    %99 = vector.broadcast %76 : vector<1x32xf32> to vector<16x32xf32>
    %100 = arith.addf %98, %99 : vector<16x32xf32>
    %cst_42 = arith.constant 0.000000e+00 : f32
    %101 = vector.broadcast %cst_42 : f32 to vector<16x32xf32>
    %102 = arith.cmpf ogt, %100, %101 : vector<16x32xf32>
    %cst_43 = arith.constant 2.000000e-01 : f32
    %103 = vector.broadcast %cst_43 : f32 to vector<16x32xf32>
    %104 = arith.mulf %103, %100 : vector<16x32xf32>
    %105 = arith.select %102, %100, %104 : vector<16x32xi1>, vector<16x32xf32>
    %106 = arith.truncf %105 : vector<16x32xf32> to vector<16x32xbf16>
    %c0_44 = arith.constant 0 : index
    %c0_45 = arith.constant 0 : index
    %107 = vector.load %arg5[%c0_44, %c0_45] : memref<32x8xbf16, #tpu.memory_space<vmem>>, vector<32x8xbf16>
    %cst_46 = arith.constant dense<0.000000e+00> : vector<16x8xf32>
    %108 = tpu.matmul %106, %107, %cst_46 {dimension_numbers = #tpu.dot_dimension_numbers<[1], [0], [0], [1], [0, 0, 1, 1], [], []>} : vector<16x32xbf16>, vector<32x8xbf16>, vector<16x8xf32> -> vector<16x8xf32>
    %c0_47 = arith.constant 0 : index
    %c768 = arith.constant 768 : index
    %109 = vector.load %arg6[%c0_47, %c768] : memref<3x1024xf32, #tpu.memory_space<vmem>>, vector<1x8xf32>
    %c1_48 = arith.constant 1 : index
    %c768_49 = arith.constant 768 : index
    %110 = vector.load %arg6[%c1_48, %c768_49] : memref<3x1024xf32, #tpu.memory_space<vmem>>, vector<1x8xf32>
    %c2_50 = arith.constant 2 : index
    %c768_51 = arith.constant 768 : index
    %111 = vector.load %arg6[%c2_50, %c768_51] : memref<3x1024xf32, #tpu.memory_space<vmem>>, vector<1x8xf32>
    %112 = vector.broadcast %109 : vector<1x8xf32> to vector<16x8xf32>
    %113 = arith.addf %108, %112 : vector<16x8xf32>
    %cst_52 = arith.constant dense<0.000000e+00> : vector<16xf32>
    %114 = vector.multi_reduction <add>, %113, %cst_52 [1] : vector<16x8xf32> to vector<16xf32>
    %115 = vector.shape_cast %114 : vector<16xf32> to vector<16x1xf32>
    %116 = arith.mulf %113, %113 : vector<16x8xf32>
    %cst_53 = arith.constant dense<0.000000e+00> : vector<16xf32>
    %117 = vector.multi_reduction <add>, %116, %cst_53 [1] : vector<16x8xf32> to vector<16xf32>
    %118 = vector.shape_cast %117 : vector<16xf32> to vector<16x1xf32>
    %cst_54 = arith.constant 1.250000e-01 : f32
    %119 = vector.broadcast %cst_54 : f32 to vector<16x1xf32>
    %120 = arith.mulf %115, %119 : vector<16x1xf32>
    %cst_55 = arith.constant 1.250000e-01 : f32
    %121 = vector.broadcast %cst_55 : f32 to vector<16x1xf32>
    %122 = arith.mulf %118, %121 : vector<16x1xf32>
    %123 = arith.mulf %120, %120 : vector<16x1xf32>
    %124 = arith.subf %122, %123 : vector<16x1xf32>
    %125 = vector.broadcast %120 : vector<16x1xf32> to vector<16x8xf32>
    %126 = arith.subf %113, %125 : vector<16x8xf32>
    %cst_56 = arith.constant 9.99999974E-6 : f32
    %127 = vector.broadcast %cst_56 : f32 to vector<16x1xf32>
    %128 = arith.addf %124, %127 : vector<16x1xf32>
    %129 = math.rsqrt %128 : vector<16x1xf32>
    %130 = vector.broadcast %129 : vector<16x1xf32> to vector<16x8xf32>
    %131 = arith.mulf %126, %130 : vector<16x8xf32>
    %132 = vector.broadcast %110 : vector<1x8xf32> to vector<16x8xf32>
    %133 = arith.mulf %131, %132 : vector<16x8xf32>
    %134 = vector.broadcast %111 : vector<1x8xf32> to vector<16x8xf32>
    %135 = arith.addf %133, %134 : vector<16x8xf32>
    %cst_57 = arith.constant 0.000000e+00 : f32
    %136 = vector.broadcast %cst_57 : f32 to vector<16x8xf32>
    %137 = arith.cmpf ogt, %135, %136 : vector<16x8xf32>
    %cst_58 = arith.constant 2.000000e-01 : f32
    %138 = vector.broadcast %cst_58 : f32 to vector<16x8xf32>
    %139 = arith.mulf %138, %135 : vector<16x8xf32>
    %140 = arith.select %137, %135, %139 : vector<16x8xi1>, vector<16x8xf32>
    %c0_59 = arith.constant 0 : index
    %c896 = arith.constant 896 : index
    %141 = vector.load %arg6[%c0_59, %c896] : memref<3x1024xf32, #tpu.memory_space<vmem>>, vector<1x8xf32>
    %c1_60 = arith.constant 1 : index
    %c896_61 = arith.constant 896 : index
    %142 = vector.load %arg6[%c1_60, %c896_61] : memref<3x1024xf32, #tpu.memory_space<vmem>>, vector<1x1xf32>
    %143 = vector.broadcast %141 : vector<1x8xf32> to vector<16x8xf32>
    %144 = arith.mulf %140, %143 : vector<16x8xf32>
    %cst_62 = arith.constant dense<0.000000e+00> : vector<16xf32>
    %145 = vector.multi_reduction <add>, %144, %cst_62 [1] : vector<16x8xf32> to vector<16xf32>
    %146 = vector.shape_cast %145 : vector<16xf32> to vector<16x1xf32>
    %147 = vector.broadcast %142 : vector<1x1xf32> to vector<16x1xf32>
    %148 = arith.addf %146, %147 : vector<16x1xf32>
    %cst_63 = arith.constant 0.000000e+00 : f32
    %149 = vector.broadcast %cst_63 : f32 to vector<16x16xf32>
    %c0_64 = arith.constant 0 : index
    %c0_65 = arith.constant 0 : index
    %150 = vector.load %arg7[%c0_64, %c0_65] : memref<16x16xf32, #tpu.memory_space<vmem>>, vector<16x16xf32>
    tpu.vector_store %arg7[%c0_64, %c0_65], %149 {strides = array<i32>} : memref<16x16xf32, #tpu.memory_space<vmem>>, vector<16x16xf32>,
    %c0_66 = arith.constant 0 : index
    %c0_67 = arith.constant 0 : index
    %151 = vector.load %arg7[%c0_66, %c0_67] : memref<16x16xf32, #tpu.memory_space<vmem>>, vector<16x8xf32>
    tpu.vector_store %arg7[%c0_66, %c0_67], %140 {strides = array<i32>} : memref<16x16xf32, #tpu.memory_space<vmem>>, vector<16x8xf32>,
    %c0_68 = arith.constant 0 : index
    %c8 = arith.constant 8 : index
    %152 = vector.load %arg7[%c0_68, %c8] : memref<16x16xf32, #tpu.memory_space<vmem>>, vector<16x1xf32>
    tpu.vector_store %arg7[%c0_68, %c8], %148 {strides = array<i32>} : memref<16x16xf32, #tpu.memory_space<vmem>>, vector<16x1xf32>,
    return
  }
  func.func @transform_0(%arg0: i32) -> (i32, i32) {
    %c0_i32 = arith.constant 0 : i32
    %c0_i32_0 = arith.constant 0 : i32
    return %arg0, %c0_i32 : i32, i32
  }
  func.func @transform_1(%arg0: i32) -> (i32, i32) {
    %c0_i32 = arith.constant 0 : i32
    %c0_i32_0 = arith.constant 0 : i32
    %c0_i32_1 = arith.constant 0 : i32
    return %c0_i32, %c0_i32_0 : i32, i32
  }
  func.func @transform_2(%arg0: i32) -> (i32, i32) {
    %c0_i32 = arith.constant 0 : i32
    %c0_i32_0 = arith.constant 0 : i32
    %c0_i32_1 = arith.constant 0 : i32
    return %c0_i32, %c0_i32_0 : i32, i32
  }
  func.func @transform_3(%arg0: i32) -> (i32, i32) {
    %c0_i32 = arith.constant 0 : i32
    %c0_i32_0 = arith.constant 0 : i32
    %c0_i32_1 = arith.constant 0 : i32
    return %c0_i32, %c0_i32_0 : i32, i32
  }
  func.func @transform_4(%arg0: i32) -> (i32, i32) {
    %c0_i32 = arith.constant 0 : i32
    %c0_i32_0 = arith.constant 0 : i32
    %c0_i32_1 = arith.constant 0 : i32
    return %c0_i32, %c0_i32_0 : i32, i32
  }
  func.func @transform_5(%arg0: i32) -> (i32, i32) {
    %c0_i32 = arith.constant 0 : i32
    %c0_i32_0 = arith.constant 0 : i32
    %c0_i32_1 = arith.constant 0 : i32
    return %c0_i32, %c0_i32_0 : i32, i32
  }
  func.func @transform_6(%arg0: i32) -> (i32, i32) {
    %c0_i32 = arith.constant 0 : i32
    %c0_i32_0 = arith.constant 0 : i32
    return %arg0, %c0_i32 : i32, i32
  }
}

</mosaic_0001>

<bundles_post_ra>
// kernel: tpu_custom_call.1
= control target key start
LH: loop header
LB: loop body
LE: loop exit
PB: predicated region body
PF: predicated region fallthrough
CT: control target
= control target key end

     0   :  { %11 = vsyncpa [#allocation3], 0  ;;  %s1715_s0 = inlined_call_operand.vmem [shape: f32[16,64], index: 0, kind: input, shape index: {}]   ;;  %s1716_s1 = inlined_call_operand.hbm [shape: bf16[64,512], index: 1, kind: input, shape index: {}]   ;;  %s1717_s2 = inlined_call_operand.hbm [shape: bf16[512,128], index: 2, kind: input, shape index: {}]   ;;  %s1718_s3 = inlined_call_operand.vmem [shape: bf16[128,32], index: 3, kind: input, shape index: {}]   ;;  %s1719_s4 = inlined_call_operand.vmem [shape: bf16[32,8], index: 4, kind: input, shape index: {}]   ;;  %s1720_s5 = inlined_call_operand.vmem [shape: f32[3,1024], index: 5, kind: input, shape index: {}]   ;;  %s1721_s6 = inlined_call_operand.hbm [shape: f32[16,16], index: 6, kind: output, shape index: {}]  }
   0x1   :  { %12 = vsyncpa [#allocation6], 0 }
   0x2   :  { %13 = vsyncpa [#allocation4], 0  ;;  %s1456_s21 = smov [#allocation2]   ;;  %s1384_s25 = scalar_lea.hbm %s1716_s1, 2048 }
   0x3   :  { %s21_s22 = sshll.u32 %s1456_s21, 4  ;;  %p1385_p0 = scmp.ne.s32.totalorder %s1716_s1, %s1384_s25  ;;  %s22_s22 = int_to_ptr.vmem [resolvable:$true] %s21_s22 }
   0x4   :  { %p1388_p1 = scmp.lt.u32.totalorder %s1384_s25, %s1716_s1 }
   0x6   :  { %p1390_p2 = pnand %p1388_p1, %p1385_p0 }
   0x8   :  { %1393 = shalt.err (!%p1390_p2)
}
   0x9   :  { %s1394_s30 = scalar_lea.vmem %s22_s22, 2048  ;;  %p1399_p4 = scmp.lt.s32.totalorder %s22_s22, %s22_s22 }
   0xa   :  { %p1395_p3 = scmp.ne.s32.totalorder %s22_s22, %s1394_s30  ;;  %p1400_p5 = scmp.lt.s32.totalorder %s1394_s30, %s1394_s30 }
   0xc   :  { %p1401_p6 = por %p1400_p5, %p1399_p4 }
   0xe   :  { %p1402_p7 = pnand %p1401_p6, %p1395_p3 }
  0x10   :  { %1405 = shalt.err (!%p1402_p7)
}
  0x11   :  { %s1457_s7 = smov 256   ;;  %s1458_s8 = smov 16  }
  0x12   :  { %27 = dma.hbm_to_vmem [thread:$0]  %s1716_s1, 2048, %s22_s22, [#allocation3], %s1457_s7, %s1457_s7, %s1458_s8  }
  0x13   :  { %s1459_s11 = smov [#allocation5]   ;;  %s1406_s15 = scalar_lea.hbm %s1717_s2, 4096 }
  0x14   :  { %s33_s12 = sshll.u32 %s1459_s11, 4  ;;  %p1407_p8 = scmp.ne.s32.totalorder %s1717_s2, %s1406_s15  ;;  %s34_s12 = int_to_ptr.vmem [resolvable:$true] %s33_s12 }
  0x15   :  { %p1410_p9 = scmp.lt.u32.totalorder %s1406_s15, %s1717_s2 }
  0x17   :  { %p1412_p10 = pnand %p1410_p9, %p1407_p8 }
  0x19   :  { %1415 = shalt.err (!%p1412_p10)
}
  0x1a   :  { %s1416_s20 = scalar_lea.vmem %s34_s12, 4096  ;;  %p1421_p12 = scmp.lt.s32.totalorder %s34_s12, %s34_s12 }
  0x1b   :  { %p1417_p11 = scmp.ne.s32.totalorder %s34_s12, %s1416_s20  ;;  %p1422_p13 = scmp.lt.s32.totalorder %s1416_s20, %s1416_s20 }
  0x1d   :  { %p1423_p0 = por %p1422_p13, %p1421_p12 }
  0x1f   :  { %p1424_p1 = pnand %p1423_p0, %p1417_p11 }
  0x21   :  { %1427 = shalt.err (!%p1424_p1)
}
  0x22   :  { %s1460_s1 = smov 64   ;;  %s1461_s21 = smov 4  }
  0x23   :  { %39 = dma.hbm_to_vmem [thread:$0]  %s1717_s2, 4096, %s34_s12, [#allocation6], %s1460_s1, %s1460_s1, %s1461_s21  }
  0x24   :  { %1450 = dma.done.wait [#allocation3], 2048  }
  0x25   :  { %1451 = vsyncadd [#allocation3], 4294965248 }
  0x26   :  { %1452 = dma.done.wait [#allocation6], 4096  }
  0x27   :  { %1453 = vsyncadd [#allocation6], 4294963200  ;;  %v1462_v0 = vmov 0   ;;  %v1302_v1 = vld [vmem:[#allocation2 + $0x4] ss:$16 sps:$4 sm:$0xff]   ;;  %v54_v10 = vld [vmem:[%s1715_s0 + $0x8] sm:$0xff]  ;;  %v78_v20 = vlaneseq }
  0x28   :  { %214 = vmatprep.mubr.bf16.mxu1 %v1462_v0  ;;  %v1304_v2 = vld [vmem:[#allocation2] ss:$16 sps:$4 sm:$0xff]   ;;  %182 = vmatprep.subr.bf16.mxu1 %v1302_v1  ;;  %v1305_v3 = vld [vmem:[#allocation2 + $0x24] ss:$16 sps:$4 sm:$0xff]   ;;  %vm178_vm0 = vcmask 523264   ;;  %vm1464_vm9 = vmmov 0  }
  0x29   :  { %183 = vmatpush1.bf16.msra.mxu1 %v1304_v2  ;;  %v1307_v4 = vld [vmem:[#allocation2 + $0x20] ss:$16 sps:$4 sm:$0xff]   ;;  %v1308_v5 = vld [vmem:[#allocation2 + $0x44] ss:$16 sps:$4 sm:$0xff]   ;;  %v1316_v11 = vld [vmem:[#allocation2 + $0xc] ss:$16 sps:$4 sm:$0xff]  }
  0x2a   :  { %184 = vmatprep.subr.bf16.mxu1 %v1305_v3  ;;  %v1310_v6 = vld [vmem:[#allocation2 + $0x40] ss:$16 sps:$4 sm:$0xff]   ;;  %v1311_v7 = vld [vmem:[#allocation2 + $0x64] ss:$16 sps:$4 sm:$0xff]   ;;  %v1314_v12 = vld [vmem:[#allocation2 + $0x8] ss:$16 sps:$4 sm:$0xff]  }
  0x2b   :  { %v1313_v8 = vld [vmem:[#allocation2 + $0x60] ss:$16 sps:$4 sm:$0xff]   ;;  %v1319_v14 = vld [vmem:[#allocation2 + $0x2c] ss:$16 sps:$4 sm:$0xff]   ;;  %v1317_v15 = vld [vmem:[#allocation2 + $0x28] ss:$16 sps:$4 sm:$0xff]  }
  0x2c   :  { %v53_v9 = vld [vmem:[%s1715_s0] sm:$0xff]  ;;  %v1322_v16 = vld [vmem:[#allocation2 + $0x4c] ss:$16 sps:$4 sm:$0xff]   ;;  %v1320_v17 = vld [vmem:[#allocation2 + $0x48] ss:$16 sps:$4 sm:$0xff]   ;;  %v79_v21 = vshrl.u32 %v78_v20, 7 }
  0x2d   :  { %185 = vmatpush1.bf16.msra.mxu1 %v1307_v4  ;;  %v55_v13 = vpack.c.bf16 %v54_v10, %v53_v9  ;;  %v1325_v18 = vld [vmem:[#allocation2 + $0x6c] ss:$16 sps:$4 sm:$0xff]   ;;  %v1323_v19 = vld [vmem:[#allocation2 + $0x68] ss:$16 sps:$4 sm:$0xff]   ;;  %v1326_v3 = vld [vmem:[#allocation5 + $0x40] sm:$0xff]   ;;  %vm912_vm12 = vcmask 261120  }
  0x2e   :  { %186 = vmatprep.subr.bf16.mxu1 %v1308_v5  ;;  %v1535_v25 = vsub.s32 0, %v79_v21  ;;  %v1537_v26 = vsub.s32 1, %v79_v21  ;;  %v72_v28 = vld [vmem:[%s1720_s5] ss:$4 sm:$0xf]  ;;  %v1544_v31 = vsub.s32 2, %v79_v21  ;;  %1206 = vmatprep.subr.bf16.mxu0 %v1326_v3 }
  0x2f   :  { %v1546_v32 = vsub.s32 3, %v79_v21  ;;  %v1327_v4 = vld [vmem:[#allocation5 + $0xc0] sm:$0xff]   ;;  %v1332_v9 = vld [vmem:[#allocation5 + $0x8] sm:$0xff]   ;;  %vm1029_vm15 = vcmask 64512   ;;  %s1465_s1 = smov 8   ;;  %s1466_s21 = smov [#allocation7]  }
  0x30   :  { %v81_v29 = vrot.slane %v72_v28, %v1535_v25  ;;  %v85_v30 = vrot.slane %v72_v28, %v1537_v26  ;;  %v89_v37 = vrot.slane %v72_v28, %v1544_v31  ;;  %v1328_v5 = vld [vmem:[#allocation5] sm:$0xff]   ;;  %v1333_v10 = vld [vmem:[#allocation5 + $0x88] sm:$0xff]   ;;  %s1119_s22 = sshll.u32 %s1466_s21, 4  ;;  %s1120_s22 = int_to_ptr.vmem [resolvable:$true] %s1119_s22 }
  0x31   :  { %187 = vmatpush1.bf16.msra.mxu1 %v1310_v6  ;;  %v93_v38 = vrot.slane %v72_v28, %v1546_v32  ;;  %v1329_v6 = vld [vmem:[#allocation5 + $0x80] sm:$0xff]   ;;  %1207 = vmatpush3.bf16.msra.mxu0 %v1328_v5  ;;  %v1349_v28 = vld [vmem:[#allocation5 + $0xa8] sm:$0xff]   ;;  %s1428_s23 = scalar_lea.vmem %s1120_s22, 256  ;;  %p1433_p3 = scmp.lt.s32.totalorder %s1120_s22, %s1120_s22 }
  0x32   :  { %188 = vmatprep.subr.bf16.mxu1 %v1311_v7  ;;  %v1330_v7 = vld [vmem:[#allocation5 + $0x48] sm:$0xff]   ;;  %v1343_v20 = vld [vmem:[#allocation5 + $0xe0] sm:$0xff]   ;;  %p1429_p2 = scmp.ne.s32.totalorder %s1120_s22, %s1428_s23  ;;  %p1434_p4 = scmp.lt.s32.totalorder %s1428_s23, %s1428_s23 }
  0x33   :  { %1208 = vmatprep.subr.bf16.mxu0 %v1330_v7  ;;  %v1344_v21 = vld [vmem:[#allocation5 + $0x20] sm:$0xff]  }
  0x34   :  { %p1435_p5 = por %p1434_p4, %p1433_p3 }
  0x35   :  { %189 = vmatpush1.bf16.msra.mxu1 %v1313_v8  ;;  %v1331_v8 = vld [vmem:[#allocation5 + $0xc8] sm:$0xff]   ;;  %1209 = vmatpush3.bf16.msra.mxu0 %v1332_v9 }
  0x36   :  { %225 = vmatprep.subr.bf16.mxu1 %v1316_v11  ;;  %v1334_v11 = vld [vmem:[#allocation5 + $0x50] sm:$0xff]   ;;  %p1436_p6 = pnand %p1435_p5, %p1429_p2 }
  0x37   :  { %1210 = vmatprep.subr.bf16.mxu0 %v1334_v11 }
  0x38   :  { %1150 = vmatmul.mubr.msk.bf16.vlgmr.msra.gmra.mrb[0].mxu1 %vm178_vm0, %v55_v13 }
  0x39   :  { %226 = vmatpush1.bf16.msra.mxu1 %v1314_v12  ;;  %257 = vmatprep.mubr.bf16.mxu1 %v1462_v0  ;;  %v1335_v12 = vld [vmem:[#allocation5 + $0xd0] sm:$0xff]  }
  0x3a   :  { %227 = vmatprep.subr.bf16.mxu1 %v1319_v14  ;;  %v1337_v14 = vld [vmem:[#allocation5 + $0x90] sm:$0xff]  }
  0x3d   :  { %228 = vmatpush1.bf16.msra.mxu1 %v1317_v15  ;;  %v1338_v15 = vld [vmem:[#allocation5 + $0x58] sm:$0xff]  }
  0x3e   :  { %229 = vmatprep.subr.bf16.mxu1 %v1322_v16  ;;  %v1339_v16 = vld [vmem:[#allocation5 + $0xd8] sm:$0xff]  }
  0x41   :  { %230 = vmatpush1.bf16.msra.mxu1 %v1320_v17  ;;  %v1340_v17 = vld [vmem:[#allocation5 + $0x18] sm:$0xff]  }
  0x42   :  { %231 = vmatprep.subr.bf16.mxu1 %v1325_v18  ;;  %v1341_v18 = vld [vmem:[#allocation5 + $0x98] sm:$0xff]  }
  0x45   :  { %232 = vmatpush1.bf16.msra.mxu1 %v1323_v19  ;;  %v1342_v19 = vld [vmem:[#allocation5 + $0x60] sm:$0xff]  }
  0x46   :  { %1228 = vmatprep.subr.bf16.mxu1 %v1327_v4 }
  0x48   :  { %1151 = vmatmul.mubr.msk.bf16.vlgmr.msra.gmra.mrb[4].mxu1 %vm178_vm0, %v55_v13  ;;  %v1336_v13 = vld [vmem:[#allocation5 + $0x10] sm:$0xff]   ;;  %vm1098_vm0 = vcmask 130048  }
  0x49   :  { %1229 = vmatpush3.bf16.msra.mxu1 %v1329_v6  ;;  %1211 = vmatpush3.bf16.msra.mxu0 %v1336_v13 }
  0x4a   :  { %1230 = vmatprep.subr.bf16.mxu1 %v1331_v8  ;;  %1212 = vmatprep.subr.bf16.mxu0 %v1338_v15 }
  0x4d   :  { %1231 = vmatpush3.bf16.msra.mxu1 %v1333_v10  ;;  %1213 = vmatpush3.bf16.msra.mxu0 %v1340_v17 }
  0x4e   :  { %1232 = vmatprep.subr.bf16.mxu1 %v1335_v12  ;;  %1214 = vmatprep.subr.bf16.mxu0 %v1342_v19 }
  0x51   :  { %1233 = vmatpush3.bf16.msra.mxu1 %v1337_v14  ;;  %1215 = vmatpush3.bf16.msra.mxu0 %v1344_v21 }
  0x52   :  { %1234 = vmatprep.subr.bf16.mxu1 %v1339_v16 }
  0x55   :  { %1235 = vmatpush3.bf16.msra.mxu1 %v1341_v18 }
  0x56   :  { %1236 = vmatprep.subr.bf16.mxu1 %v1343_v20 }
 0x10b   :  { %v216_v22 = vpop.f32.mrb[0].mxu1 }
 0x10c   :  { %v218_v23 = vpop.f32.mrb[1].mxu1  ;;  %v1548_v33 = vadd.f32 %v216_v22, %v81_v29  ;;  %v1345_v22 = vld [vmem:[#allocation5 + $0xa0] sm:$0xff]  }
 0x10d   :  { %v220_v24 = vpop.f32.mrb[2].mxu1  ;;  %v1550_v34 = vadd.f32 %v218_v23, %v85_v30  ;;  %v1346_v23 = vld [vmem:[#allocation5 + $0x68] sm:$0xff]   ;;  %1237 = vmatpush3.bf16.msra.mxu1 %v1345_v22 }
 0x10e   :  { %v222_v27 = vpop.f32.mrb[3].mxu1  ;;  %v1552_v35 = vadd.f32 %v220_v24, %v81_v29  ;;  %v278_v39 = vmul.f32 %v1548_v33, %v1548_v33  ;;  %v1347_v24 = vld [vmem:[#allocation5 + $0xe8] sm:$0xff]   ;;  %1216 = vmatprep.subr.bf16.mxu0 %v1346_v23  ;;  %v1350_v29 = vld [vmem:[#allocation5 + $0x70] sm:$0xff]  }
 0x10f   :  { %v1554_v36 = vadd.f32 %v222_v27, %v85_v30  ;;  %v279_v40 = vmul.f32 %v1550_v34, %v1550_v34  ;;  %v268_v46 = vadd.f32 %v1550_v34, %v1548_v33  ;;  %v1348_v27 = vld [vmem:[#allocation5 + $0x28] sm:$0xff]   ;;  %1238 = vmatprep.subr.bf16.mxu1 %v1347_v24  ;;  %v1351_v30 = vld [vmem:[#allocation5 + $0xf0] sm:$0xff]  }
 0x110   :  { %v282_v41 = vmul.f32 %v1552_v35, %v1552_v35  ;;  %1217 = vmatpush3.bf16.msra.mxu0 %v1348_v27 }
 0x111   :  { %v283_v42 = vmul.f32 %v1554_v36, %v1554_v36  ;;  %v273_v47 = vadd.f32 %v1554_v36, %v1552_v35  ;;  %v286_v54 = vadd.f32 %v279_v40, %v278_v39  ;;  %1239 = vmatpush3.bf16.msra.mxu1 %v1349_v28  ;;  %1218 = vmatprep.subr.bf16.mxu0 %v1350_v29  ;;  %v1354_v39 = vld [vmem:[#allocation5 + $0x78] sm:$0xff]  }
 0x112   :  { %1240 = vmatprep.subr.bf16.mxu1 %v1351_v30  ;;  %v1355_v40 = vld [vmem:[#allocation5 + $0xf8] sm:$0xff]  }
 0x113   :  { %v291_v57 = vadd.f32 %v283_v42, %v282_v41  ;;  %v1356_v41 = vld [vmem:[#allocation5 + $0x38] sm:$0xff]  }
 0x114   :  { %v1357_v42 = vld [vmem:[#allocation5 + $0xb8] sm:$0xff]  }
 0x11b   :  { %v259_v43 = vpop.f32.mrb[4].mxu1 }
 0x11c   :  { %v1566_v44 = vadd.f32 %v259_v43, %v89_v37  ;;  %v261_v45 = vpop.f32.mrb[5].mxu1 }
 0x11d   :  { %v1572_v48 = vadd.f32 %v261_v45, %v93_v38  ;;  %v263_v49 = vpop.f32.mrb[6].mxu1 }
 0x11e   :  { %v1574_v50 = vadd.f32 %v263_v49, %v89_v37  ;;  %v265_v51 = vpop.f32.mrb[7].mxu1  ;;  %v269_v52 = vadd.f32 %v268_v46, %v1566_v44  ;;  %v280_v53 = vmul.f32 %v1566_v44, %v1566_v44  ;;  %v1352_v37 = vld [vmem:[#allocation5 + $0x30] sm:$0xff]  }
 0x11f   :  { %v1579_v55 = vadd.f32 %v265_v51, %v93_v38  ;;  %v281_v56 = vmul.f32 %v1572_v48, %v1572_v48  ;;  %v1353_v38 = vld [vmem:[#allocation5 + $0xb0] sm:$0xff]   ;;  %1219 = vmatpush3.bf16.msra.mxu0 %v1352_v37 }
 0x120   :  { %v284_v58 = vmul.f32 %v1574_v50, %v1574_v50  ;;  %v270_v59 = vadd.f32 %v269_v52, %v1572_v48  ;;  %v287_v60 = vadd.f32 %v286_v54, %v280_v53  ;;  %v274_v61 = vadd.f32 %v273_v47, %v1574_v50  ;;  %1241 = vmatpush3.bf16.msra.mxu1 %v1353_v38 }
 0x121   :  { %v285_v63 = vmul.f32 %v1579_v55, %v1579_v55  ;;  %1220 = vmatprep.subr.bf16.mxu0 %v1354_v39  ;;  %1242 = vmatprep.subr.bf16.mxu1 %v1355_v40 }
 0x122   :  { %271 = vadd.xlane.f32.xlu0 %v270_v59  ;;  %v288_v62 = vadd.f32 %v287_v60, %v281_v56  ;;  %v292_v0 = vadd.f32 %v291_v57, %v284_v58  ;;  %v275_v1 = vadd.f32 %v274_v61, %v1579_v55  ;;  %v1132_v61 = vld [vmem:[%s1720_s5 + $0x1] ss:$4 sm:$0xf] }
 0x123   :  { %1221 = vmatpush3.bf16.msra.mxu0 %v1356_v41  ;;  %v336_v7 = vrot.slane %v1132_v61, %v1544_v31 }
 0x124   :  { %289 = vadd.xlane.f32.xlu1 %v288_v62  ;;  %v293_v2 = vadd.f32 %v292_v0, %v285_v63  ;;  %1243 = vmatpush3.bf16.msra.mxu1 %v1357_v42  ;;  %v1133_v62 = vld [vmem:[%s1720_s5 + $0x2] ss:$4 sm:$0xf]  ;;  %v328_v63 = vrot.slane %v1132_v61, %v1535_v25  ;;  %v340_v0 = vrot.slane %v1132_v61, %v1546_v32 }
 0x125   :  { %v361_v8 = vrot.slane %v1133_v62, %v1537_v26  ;;  %v369_v9 = vrot.slane %v1133_v62, %v1546_v32  ;;  %v365_v17 = vrot.slane %v1133_v62, %v1544_v31 }
 0x126   :  { %276 = vadd.xlane.f32.xlu0 %v275_v1  ;;  %v332_v1 = vrot.slane %v1132_v61, %v1537_v26 }
 0x128   :  { %294 = vadd.xlane.f32.xlu1 %v293_v2 }
 0x1af   :  { %v272_v43 = vpop.xlane.xlu0 %271 }
 0x1b0   :  { %v296_v45 = vmul.f32 0.001953125, %v272_v43 }
 0x1b1   :  { %v290_v46 = vpop.xlane.xlu1 %289 }
 0x1b2   :  { %v298_v47 = vmul.f32 0.001953125, %v290_v46  ;;  %v300_v49 = vmul.f32 %v296_v45, %v296_v45  ;;  %v304_v2 = vsub.f32 %v1548_v33, %v296_v45  ;;  %v306_v3 = vsub.f32 %v1566_v44, %v296_v45 }
 0x1b3   :  { %v277_v51 = vpop.xlane.xlu0 %276  ;;  %v307_v4 = vsub.f32 %v1572_v48, %v296_v45  ;;  %v305_v5 = vsub.f32 %v1550_v34, %v296_v45  ;;  %v357_v33 = vrot.slane %v1133_v62, %v1535_v25  ;;  %v1152_v62 = vld [vmem:[%s1720_s5 + $0x10] ss:$0 sm:$0xff] }
 0x1b4   :  { %v297_v52 = vmul.f32 0.001953125, %v277_v51  ;;  %v302_v53 = vsub.f32 %v298_v47, %v300_v49 }
 0x1b5   :  { %v295_v54 = vpop.xlane.xlu1 %294 }
 0x1b6   :  { %v299_v56 = vmul.f32 0.001953125, %v295_v54  ;;  %v312_v57 = vadd.f32 1e-05, %v302_v53  ;;  %v301_v58 = vmul.f32 %v297_v52, %v297_v52  ;;  %v311_v14 = vsub.f32 %v1579_v55, %v297_v52 }
 0x1b7   :  { %v309_v44 = vsub.f32 %v1554_v36, %v297_v52  ;;  %v308_v26 = vsub.f32 %v1552_v35, %v297_v52  ;;  %v310_v32 = vsub.f32 %v1574_v50, %v297_v52 }
 0x1b8   :  { %1368 = vrsqrt.f32 %v312_v57  ;;  %v303_v59 = vsub.f32 %v299_v56, %v301_v58 }
 0x1ba   :  { %v313_v60 = vadd.f32 1e-05, %v303_v59 }
 0x1bc   :  { %1370 = vrsqrt.f32 %v313_v60 }
 0x1c2   :  { %v1369_v6 = vpop.eup %1368 }
 0x1c3   :  { %v317_v10 = vmul.f32 %v1369_v6, %v305_v5  ;;  %v319_v11 = vmul.f32 %v1369_v6, %v307_v4  ;;  %v316_v12 = vmul.f32 %v1369_v6, %v304_v2  ;;  %v318_v13 = vmul.f32 %v1369_v6, %v306_v3 }
 0x1c5   :  { %v346_v48 = vmul.f32 %v332_v1, %v317_v10  ;;  %v348_v15 = vmul.f32 %v340_v0, %v319_v11  ;;  %v345_v34 = vmul.f32 %v328_v63, %v316_v12  ;;  %v347_v18 = vmul.f32 %v336_v7, %v318_v13 }
 0x1c6   :  { %v1371_v16 = vpop.eup %1370 }
 0x1c7   :  { %v321_v19 = vmul.f32 %v1371_v16, %v309_v44  ;;  %v375_v20 = vadd.f32 %v361_v8, %v346_v48  ;;  %v323_v21 = vmul.f32 %v1371_v16, %v311_v14  ;;  %v377_v22 = vadd.f32 %v369_v9, %v348_v15  ;;  %v1358_v44 = vld [vmem:[%s1718_s3] sm:$0xff]   ;;  %v1359_v15 = vld [vmem:[%s1718_s3 + $0x8] sm:$0xff]  }
 0x1c8   :  { %v320_v55 = vmul.f32 %v1371_v16, %v308_v26  ;;  %v374_v23 = vadd.f32 %v357_v33, %v345_v34  ;;  %v322_v25 = vmul.f32 %v1371_v16, %v310_v32  ;;  %v376_v31 = vadd.f32 %v365_v17, %v347_v18  ;;  %v1360_v34 = vld [vmem:[%s1718_s3 + $0x10] sm:$0xff]   ;;  %v1361_v16 = vld [vmem:[%s1718_s3 + $0x18] sm:$0xff]   ;;  %v1363_v26 = vld [vmem:[%s1718_s3 + $0x28] sm:$0xff]  }
 0x1c9   :  { %v350_v24 = vmul.f32 %v332_v1, %v321_v19  ;;  %vm383_vm1 = vcmp.gt.f32.partialorder %v375_v20, 0.0  ;;  %v391_v36 = vmul.f32 0.2, %v375_v20  ;;  %v352_v27 = vmul.f32 %v340_v0, %v323_v21  ;;  %v1364_v32 = vld [vmem:[%s1718_s3 + $0x30] sm:$0xff]   ;;  %v1365_v18 = vld [vmem:[%s1718_s3 + $0x38] sm:$0xff]  }
 0x1ca   :  { %vm385_vm2 = vcmp.gt.f32.partialorder %v377_v22, 0.0  ;;  %v393_v28 = vmul.f32 0.2, %v377_v22  ;;  %v349_v29 = vmul.f32 %v328_v63, %v320_v55  ;;  %vm382_vm3 = vcmp.gt.f32.partialorder %v374_v23, 0.0 }
 0x1cb   :  { %v379_v30 = vadd.f32 %v361_v8, %v350_v24  ;;  %v381_v35 = vadd.f32 %v369_v9, %v352_v27  ;;  %v390_v50 = vmul.f32 0.2, %v374_v23  ;;  %v399_v37 = vsel %vm383_vm1, %v375_v20, %v391_v36 }
 0x1cc   :  { %v401_v38 = vsel %vm385_vm2, %v377_v22, %v393_v28  ;;  %v378_v39 = vadd.f32 %v357_v33, %v349_v29  ;;  %v351_v40 = vmul.f32 %v336_v7, %v322_v25  ;;  %vm384_vm7 = vcmp.gt.f32.partialorder %v376_v31, 0.0 }
 0x1cd   :  { %vm387_vm4 = vcmp.gt.f32.partialorder %v379_v30, 0.0  ;;  %v395_v41 = vmul.f32 0.2, %v379_v30  ;;  %vm389_vm5 = vcmp.gt.f32.partialorder %v381_v35, 0.0  ;;  %v397_v42 = vmul.f32 0.2, %v381_v35 }
 0x1ce   :  { %vm386_vm6 = vcmp.gt.f32.partialorder %v378_v39, 0.0  ;;  %v394_v43 = vmul.f32 0.2, %v378_v39  ;;  %v380_v45 = vadd.f32 %v365_v17, %v351_v40  ;;  %v398_v49 = vsel %vm382_vm3, %v374_v23, %v390_v50  ;;  %v1362_v17 = vld [vmem:[%s1718_s3 + $0x20] sm:$0xff]  }
 0x1cf   :  { %v403_v46 = vsel %vm387_vm4, %v379_v30, %v395_v41  ;;  %v405_v47 = vsel %vm389_vm5, %v381_v35, %v397_v42  ;;  %v392_v51 = vmul.f32 0.2, %v376_v31  ;;  %v1463_v48 = vmov 0.0   ;;  %v1186_v41 = vld [vmem:[%s1720_s5 + $0x12] ss:$0 sm:$0xff] }
 0x1d0   :  { %v407_v52 = vpack.c.bf16 %v403_v46, %v399_v37  ;;  %v409_v53 = vpack.c.bf16 %v405_v47, %v401_v38  ;;  %v402_v54 = vsel %vm386_vm6, %v378_v39, %v394_v43  ;;  %vm388_vm8 = vcmp.gt.f32.partialorder %v380_v45, 0.0  ;;  %1262 = vmatprep.subr.bf16.mxu0 %v1463_v48  ;;  %1282 = vmatprep.subr.bf16.mxu1 %v1463_v48  ;;  %v1185_v37 = vld [vmem:[%s1720_s5 + $0x11] ss:$0 sm:$0xff] }
 0x1d1   :  { %v406_v56 = vpack.c.bf16 %v402_v54, %v398_v49  ;;  %v396_v57 = vmul.f32 0.2, %v380_v45  ;;  %v400_v58 = vsel %vm384_vm7, %v376_v31, %v392_v51  ;;  %1099 = vst.msk [vmem:[#allocation7] sm:$0xff] %vm1098_vm0, %v1463_v48  ;;  %1100 = vst.msk [vmem:[#allocation7 + $0x8] sm:$0xff] %vm1098_vm0, %v1463_v48  ;;  %vm1111_vm3 = vcmask 72768  }
 0x1d2   :  { %705 = vmatprep.mubr.bf16.mxu0 %v407_v52  ;;  %746 = vmatprep.mubr.bf16.mxu1 %v409_v53 }
 0x1d3   :  { %706 = vmatmul.mubr.bf16.vlgmr.msra.gmra.mrb[0].mxu0 %v406_v56  ;;  %v404_v59 = vsel %vm388_vm8, %v380_v45, %v396_v57  ;;  %v1187_v56 = vld [vmem:[%s1720_s5 + $0x14] ss:$0 sm:$0xff] }
 0x1d4   :  { %v408_v60 = vpack.c.bf16 %v404_v59, %v400_v58  ;;  %1263 = vmatpush3.bf16.msra.mxu0 %v1358_v44  ;;  %1278 = vmatprep.mubr.msk.bf16.mxu0 %vm1464_vm9, %v1463_v48 }
 0x1d5   :  { %1264 = vmatprep.subr.bf16.mxu0 %v1463_v48 }
 0x1d6   :  { %747 = vmatmul.mubr.bf16.vlgmr.msra.gmra.mrb[8].mxu1 %v408_v60 }
 0x1d7   :  { %1286 = vmatprep.mubr.msk.bf16.mxu1 %vm1464_vm9, %v1463_v48 }
 0x1d8   :  { %1265 = vmatpush3.bf16.msra.mxu0 %v1359_v15 }
 0x1d9   :  { %1266 = vmatprep.subr.bf16.mxu0 %v1463_v48 }
 0x1dc   :  { %1267 = vmatpush3.bf16.msra.mxu0 %v1360_v34 }
 0x1dd   :  { %1268 = vmatprep.subr.bf16.mxu0 %v1463_v48 }
 0x1e0   :  { %1269 = vmatpush3.bf16.msra.mxu0 %v1361_v16 }
 0x1e1   :  { %1270 = vmatprep.subr.bf16.mxu0 %v1463_v48 }
 0x1e4   :  { %1271 = vmatpush3.bf16.msra.mxu0 %v1362_v17 }
 0x1e5   :  { %1272 = vmatprep.subr.bf16.mxu0 %v1463_v48 }
 0x1e8   :  { %1273 = vmatpush3.bf16.msra.mxu0 %v1363_v26 }
 0x1e9   :  { %1274 = vmatprep.subr.bf16.mxu0 %v1463_v48 }
 0x1ec   :  { %1275 = vmatpush3.bf16.msra.mxu0 %v1364_v32 }
 0x1ed   :  { %1276 = vmatprep.subr.bf16.mxu0 %v1463_v48 }
 0x1f0   :  { %1277 = vmatpush3.bf16.msra.mxu0 %v1365_v18  ;;  %v1196_v18 = vld [vmem:[%s1720_s5 + $0x15] ss:$0 sm:$0xff] }
 0x2a6   :  { %v1222_v61 = vpop.f32.mrb[0].mxu0 }
 0x2a7   :  { %v1223_v63 = vpop.f32.mrb[1].mxu0 }
 0x2a8   :  { %v1224_v0 = vadd.f32 %v1223_v63, %v1222_v61  ;;  %v1225_v1 = vpop.f32.mrb[2].mxu0 }
 0x2a9   :  { %v1244_v2 = vpop.f32.mrb[8].mxu1  ;;  %v1226_v3 = vpop.f32.mrb[3].mxu0 }
 0x2aa   :  { %v708_v4 = vadd.f32 %v1224_v0, %v1152_v62  ;;  %v1245_v5 = vpop.f32.mrb[9].mxu1  ;;  %v1227_v6 = vadd.f32 %v1226_v3, %v1225_v1 }
 0x2ab   :  { %v1246_v7 = vadd.f32 %v1245_v5, %v1244_v2  ;;  %v1247_v8 = vpop.f32.mrb[10].mxu1  ;;  %v1366_v5 = vld [vmem:[%s1719_s4] sm:$0xff]  }
 0x2ac   :  { %v711_v9 = vadd.f32 %v1227_v6, %v1152_v62  ;;  %v1248_v10 = vpop.f32.mrb[11].mxu1  ;;  %1283 = vmatpush3.bf16.msra.mxu1 %v1366_v5  ;;  %v1367_v6 = vld [vmem:[%s1719_s4 + $0x8] sm:$0xff]  }
 0x2ad   :  { %v749_v11 = vadd.f32 %v1246_v7, %v708_v4  ;;  %v1249_v12 = vadd.f32 %v1248_v10, %v1247_v8  ;;  %1284 = vmatprep.subr.bf16.mxu1 %v1463_v48  ;;  %v1202_v48 = vld [vmem:[%s1720_s5 + $0x19] ss:$0 sm:$0xff] }
 0x2af   :  { %v752_v13 = vadd.f32 %v1249_v12, %v711_v9  ;;  %755 = vadd.xlane.f32.xlu0 %v749_v11  ;;  %v759_v14 = vmul.f32 %v749_v11, %v749_v11 }
 0x2b0   :  { %1285 = vmatpush3.bf16.msra.mxu1 %v1367_v6 }
 0x2b1   :  { %757 = vadd.xlane.f32.xlu1 %v752_v13  ;;  %v760_v33 = vmul.f32 %v752_v13, %v752_v13 }
 0x2b3   :  { %761 = vadd.xlane.f32.xlu0 %v759_v14 }
 0x2b5   :  { %763 = vadd.xlane.f32.xlu1 %v760_v33 }
 0x33c   :  { %v756_v19 = vpop.xlane.xlu0 %755 }
 0x33d   :  { %v765_v20 = vmul.f32 0.0078125, %v756_v19 }
 0x33e   :  { %v758_v21 = vpop.xlane.xlu1 %757 }
 0x33f   :  { %v766_v22 = vmul.f32 0.0078125, %v758_v21  ;;  %v769_v23 = vmul.f32 %v765_v20, %v765_v20  ;;  %v773_v35 = vsub.f32 %v749_v11, %v765_v20 }
 0x340   :  { %v762_v55 = vpop.xlane.xlu0 %761 }
 0x341   :  { %v767_v25 = vmul.f32 0.0078125, %v762_v55  ;;  %v770_v36 = vmul.f32 %v766_v22, %v766_v22  ;;  %v774_v38 = vsub.f32 %v752_v13, %v766_v22  ;;  %v1197_v22 = vld [vmem:[%s1720_s5 + $0x16] ss:$0 sm:$0xff] }
 0x342   :  { %v764_v24 = vpop.xlane.xlu1 %763 }
 0x343   :  { %v771_v27 = vsub.f32 %v767_v25, %v769_v23  ;;  %v768_v28 = vmul.f32 0.0078125, %v764_v24 }
 0x345   :  { %v775_v29 = vadd.f32 1e-05, %v771_v27  ;;  %v772_v31 = vsub.f32 %v768_v28, %v770_v36 }
 0x347   :  { %1372 = vrsqrt.f32 %v775_v29  ;;  %v776_v30 = vadd.f32 1e-05, %v772_v31 }
 0x349   :  { %1374 = vrsqrt.f32 %v776_v30 }
 0x351   :  { %v1373_v50 = vpop.eup %1372 }
 0x352   :  { %v779_v39 = vmul.f32 %v1373_v50, %v773_v35  ;;  %v1198_v35 = vld [vmem:[%s1720_s5 + $0x18] ss:$0 sm:$0xff] }
 0x353   :  { %v1375_v40 = vpop.eup %1374 }
 0x354   :  { %v780_v42 = vmul.f32 %v1375_v40, %v774_v38  ;;  %v785_v43 = vmul.f32 %v1185_v37, %v779_v39 }
 0x356   :  { %v786_v45 = vmul.f32 %v1185_v37, %v780_v42  ;;  %v791_v46 = vadd.f32 %v1186_v41, %v785_v43 }
 0x358   :  { %v792_v47 = vadd.f32 %v1186_v41, %v786_v45  ;;  %v795_v49 = vmul.f32 0.2, %v791_v46  ;;  %vm793_vm10 = vcmp.gt.f32.partialorder %v791_v46, 0.0 }
 0x35a   :  { %vm794_vm11 = vcmp.gt.f32.partialorder %v792_v47, 0.0  ;;  %v796_v51 = vmul.f32 0.2, %v792_v47  ;;  %v797_v52 = vsel %vm793_vm10, %v791_v46, %v795_v49 }
 0x35c   :  { %v798_v53 = vsel %vm794_vm11, %v792_v47, %v796_v51 }
 0x35d   :  { %v799_v54 = vpack.c.bf16 %v798_v53, %v797_v52 }
 0x35f   :  { %1279 = vmatmul.mubr.bf16.vlgmr.msra.gmra.mrb[4].mxu0 %v799_v54 }
 0x432   :  { %v905_v57 = vpop.f32.mrb[4].mxu0 }
 0x433   :  { %v906_v58 = vadd.f32 %v1187_v56, %v905_v57  ;;  %v1280_v59 = vpop.f32.mrb[5].mxu0 }
 0x434   :  { %v908_v60 = vpop.f32.mrb[6].mxu0 }
 0x435   :  { %v909_v61 = vadd.f32 %v1187_v56, %v908_v60  ;;  %v1281_v62 = vpop.f32.mrb[7].mxu0  ;;  %v913_v63 = vsel %vm912_vm12, %v906_v58, 0.0  ;;  %v919_v0 = vmul.f32 %v906_v58, %v906_v58 }
 0x436   :  { %914 = vadd.xlane.f32.xlu0 %v913_v63 }
 0x437   :  { %v916_v1 = vsel %vm912_vm12, %v909_v61, 0.0  ;;  %v920_v2 = vmul.f32 %v909_v61, %v909_v61  ;;  %v921_v3 = vsel %vm912_vm12, %v919_v0, 0.0 }
 0x438   :  { %917 = vadd.xlane.f32.xlu1 %v916_v1 }
 0x439   :  { %v924_v4 = vsel %vm912_vm12, %v920_v2, 0.0 }
 0x43a   :  { %922 = vadd.xlane.f32.xlu0 %v921_v3 }
 0x43c   :  { %925 = vadd.xlane.f32.xlu1 %v924_v4 }
 0x4c3   :  { %v915_v7 = vpop.xlane.xlu0 %914 }
 0x4c4   :  { %v927_v8 = vmul.f32 0.03125, %v915_v7  ;;  %v1203_v7 = vld [vmem:[%s1720_s5 + $0x1a] ss:$0 sm:$0xff] }
 0x4c5   :  { %v918_v9 = vpop.xlane.xlu1 %917 }
 0x4c6   :  { %v928_v10 = vmul.f32 0.03125, %v918_v9  ;;  %v931_v12 = vmul.f32 %v927_v8, %v927_v8  ;;  %v935_v26 = vsub.f32 %v906_v58, %v927_v8 }
 0x4c7   :  { %v923_v11 = vpop.xlane.xlu0 %922 }
 0x4c8   :  { %v929_v13 = vmul.f32 0.03125, %v923_v11  ;;  %v932_v33 = vmul.f32 %v928_v10, %v928_v10  ;;  %v936_v19 = vsub.f32 %v909_v61, %v928_v10 }
 0x4c9   :  { %v926_v14 = vpop.xlane.xlu1 %925 }
 0x4ca   :  { %v933_v44 = vsub.f32 %v929_v13, %v931_v12  ;;  %v930_v15 = vmul.f32 0.03125, %v926_v14  ;;  %v1204_v13 = vld [vmem:[%s1720_s5 + $0x1c] ss:$0 sm:$0xff] }
 0x4cc   :  { %v937_v34 = vadd.f32 1e-05, %v933_v44  ;;  %v934_v16 = vsub.f32 %v930_v15, %v932_v33 }
 0x4ce   :  { %1376 = vrsqrt.f32 %v937_v34  ;;  %v938_v17 = vadd.f32 1e-05, %v934_v16 }
 0x4d0   :  { %1378 = vrsqrt.f32 %v938_v17 }
 0x4d8   :  { %v1377_v32 = vpop.eup %1376 }
 0x4d9   :  { %v941_v20 = vmul.f32 %v1377_v32, %v935_v26  ;;  %v1205_v32 = vld [vmem:[%s1720_s5 + $0x1d] ss:$0 sm:$0xff] }
 0x4da   :  { %v1379_v21 = vpop.eup %1378 }
 0x4db   :  { %v947_v55 = vmul.f32 %v1196_v18, %v941_v20  ;;  %v942_v23 = vmul.f32 %v1379_v21, %v936_v19 }
 0x4dd   :  { %v948_v25 = vmul.f32 %v1196_v18, %v942_v23  ;;  %v953_v24 = vadd.f32 %v1197_v22, %v947_v55 }
 0x4df   :  { %v954_v36 = vadd.f32 %v1197_v22, %v948_v25  ;;  %v957_v27 = vmul.f32 0.2, %v953_v24  ;;  %vm955_vm13 = vcmp.gt.f32.partialorder %v953_v24, 0.0 }
 0x4e1   :  { %vm956_vm14 = vcmp.gt.f32.partialorder %v954_v36, 0.0  ;;  %v958_v28 = vmul.f32 0.2, %v954_v36  ;;  %v959_v29 = vsel %vm955_vm13, %v953_v24, %v957_v27 }
 0x4e3   :  { %v960_v31 = vsel %vm956_vm14, %v954_v36, %v958_v28 }
 0x4e4   :  { %v961_v30 = vpack.c.bf16 %v960_v31, %v959_v29 }
 0x4e6   :  { %1287 = vmatmul.mubr.msk.bf16.vlgmr.msra.gmra.mrb[12].mxu1 %vm912_vm12, %v961_v30 }
 0x5b9   :  { %v1022_v50 = vpop.f32.mrb[12].mxu1 }
 0x5ba   :  { %v1023_v37 = vadd.f32 %v1198_v35, %v1022_v50  ;;  %v1288_v38 = vpop.f32.mrb[13].mxu1 }
 0x5bb   :  { %v1025_v39 = vpop.f32.mrb[14].mxu1 }
 0x5bc   :  { %v1026_v40 = vadd.f32 %v1198_v35, %v1025_v39  ;;  %v1289_v41 = vpop.f32.mrb[15].mxu1  ;;  %v1030_v42 = vsel %vm1029_vm15, %v1023_v37, 0.0  ;;  %v1036_v43 = vmul.f32 %v1023_v37, %v1023_v37 }
 0x5bd   :  { %1031 = vadd.xlane.f32.xlu0 %v1030_v42 }
 0x5be   :  { %v1033_v45 = vsel %vm1029_vm15, %v1026_v40, 0.0  ;;  %v1037_v46 = vmul.f32 %v1026_v40, %v1026_v40  ;;  %v1038_v47 = vsel %vm1029_vm15, %v1036_v43, 0.0 }
 0x5bf   :  { %1034 = vadd.xlane.f32.xlu1 %v1033_v45 }
 0x5c0   :  { %v1041_v49 = vsel %vm1029_vm15, %v1037_v46, 0.0 }
 0x5c1   :  { %1039 = vadd.xlane.f32.xlu0 %v1038_v47 }
 0x5c3   :  { %1042 = vadd.xlane.f32.xlu1 %v1041_v49 }
 0x64a   :  { %v1032_v51 = vpop.xlane.xlu0 %1031 }
 0x64b   :  { %v1044_v52 = vmul.f32 0.125, %v1032_v51 }
 0x64c   :  { %v1035_v53 = vpop.xlane.xlu1 %1034 }
 0x64d   :  { %v1045_v54 = vmul.f32 0.125, %v1035_v53  ;;  %v1048_v57 = vmul.f32 %v1044_v52, %v1044_v52  ;;  %v1052_v2 = vsub.f32 %v1023_v37, %v1044_v52 }
 0x64e   :  { %v1040_v56 = vpop.xlane.xlu0 %1039 }
 0x64f   :  { %v1046_v58 = vmul.f32 0.125, %v1040_v56  ;;  %v1049_v60 = vmul.f32 %v1045_v54, %v1045_v54  ;;  %v1053_v4 = vsub.f32 %v1026_v40, %v1045_v54 }
 0x650   :  { %v1043_v59 = vpop.xlane.xlu1 %1042 }
 0x651   :  { %v1050_v61 = vsub.f32 %v1046_v58, %v1048_v57  ;;  %v1047_v62 = vmul.f32 0.125, %v1043_v59 }
 0x653   :  { %v1054_v63 = vadd.f32 1e-05, %v1050_v61  ;;  %v1051_v0 = vsub.f32 %v1047_v62, %v1049_v60 }
 0x655   :  { %1380 = vrsqrt.f32 %v1054_v63  ;;  %v1055_v1 = vadd.f32 1e-05, %v1051_v0 }
 0x657   :  { %1382 = vrsqrt.f32 %v1055_v1 }
 0x65f   :  { %v1381_v3 = vpop.eup %1380 }
 0x660   :  { %v1058_v5 = vmul.f32 %v1381_v3, %v1052_v2 }
 0x661   :  { %v1383_v6 = vpop.eup %1382 }
 0x662   :  { %v1064_v8 = vmul.f32 %v1202_v48, %v1058_v5  ;;  %v1059_v9 = vmul.f32 %v1383_v6, %v1053_v4 }
 0x664   :  { %v1070_v10 = vadd.f32 %v1203_v7, %v1064_v8  ;;  %v1065_v11 = vmul.f32 %v1202_v48, %v1059_v9 }
 0x666   :  { %vm1072_vm1 = vcmp.gt.f32.partialorder %v1070_v10, 0.0  ;;  %v1074_v12 = vmul.f32 0.2, %v1070_v10  ;;  %v1071_v14 = vadd.f32 %v1203_v7, %v1065_v11 }
 0x668   :  { %v1076_v33 = vsel %vm1072_vm1, %v1070_v10, %v1074_v12  ;;  %vm1073_vm2 = vcmp.gt.f32.partialorder %v1071_v14, 0.0  ;;  %v1075_v44 = vmul.f32 0.2, %v1071_v14 }
 0x669   :  { %v1084_v15 = vmul.f32 %v1204_v13, %v1076_v33  ;;  %1101 = vst.msk [vmem:[#allocation7] sm:$0xff] %vm1029_vm15, %v1076_v33 }
 0x66a   :  { %v1077_v34 = vsel %vm1073_vm2, %v1071_v14, %v1075_v44 }
 0x66b   :  { %v1086_v16 = vsel %vm1029_vm15, %v1084_v15, 0.0  ;;  %v1085_v17 = vmul.f32 %v1204_v13, %v1077_v34  ;;  %1102 = vst.msk [vmem:[#allocation7 + $0x8] sm:$0xff] %vm1029_vm15, %v1077_v34 }
 0x66c   :  { %1087 = vadd.xlane.f32.xlu0 %v1086_v16 }
 0x66d   :  { %v1089_v26 = vsel %vm1029_vm15, %v1085_v17, 0.0 }
 0x66e   :  { %1090 = vadd.xlane.f32.xlu1 %v1089_v26 }
 0x6f9   :  { %v1088_v18 = vpop.xlane.xlu0 %1087 }
 0x6fa   :  { %v1096_v19 = vadd.f32 %v1205_v32, %v1088_v18 }
 0x6fb   :  { %v1091_v20 = vpop.xlane.xlu1 %1090 }
 0x6fc   :  { %v1097_v21 = vadd.f32 %v1205_v32, %v1091_v20  ;;  %1105 = vrot.lane.b32.xlu0 %v1096_v19, %s1465_s1 }
 0x6fe   :  { %1107 = vrot.lane.b32.xlu1 %v1097_v21, %s1465_s1 }
 0x76e   :  { %v1106_v22 = vpop.permute.xlu0 %1105 }
 0x76f   :  { %1112 = vst.msk [vmem:[#allocation7] sm:$0xff] %vm1111_vm3, %v1106_v22 }
 0x770   :  { %v1108_v55 = vpop.permute.xlu1 %1107 }
 0x771   :  { %1113 = vst.msk [vmem:[#allocation7 + $0x8] sm:$0xff] %vm1111_vm3, %v1108_v55 }
 0x772   :  { %1439 = shalt.err (!%p1436_p6)
}
 0x773   :  { %s1440_s3 = scalar_lea.hbm %s1721_s6, 256 }
 0x774   :  { %p1441_p7 = scmp.ne.s32.totalorder %s1721_s6, %s1440_s3  ;;  %p1444_p8 = scmp.lt.u32.totalorder %s1440_s3, %s1721_s6 }
 0x776   :  { %p1446_p9 = pnand %p1444_p8, %p1441_p7 }
 0x778   :  { %1449 = shalt.err (!%p1446_p9)
}
 0x779   :  { %s1467_s27 = smov 128  }
 0x77a   :  { %1125 = dma.vmem_to_hbm [thread:$0]  %s1120_s22, 256, %s1721_s6, [#allocation4], %s1467_s27, %s1467_s27, %s1465_s1  }
 0x77b   :  { %1454 = dma.done.wait [#allocation4], 256  }
 0x77c   :  { %1455 = vsyncadd [#allocation4], 4294967040 }
 0x77d   :  { %1129 = vsyncpa [#allocation3], 1 }
 0x77e   :  { %1130 = vsyncpa [#allocation6], 1 }
 0x77f   :  { %1131 = vsyncpa [#allocation4], 1 }

</bundles_post_ra>
